<compile_context>
chip_gen: v7x
topology: tpu7x:2x2x1
jax: 0.10.0
libtpu: 0.0.40
codegen_flags: <defaults>
</compile_context>

<pallas_src>
import functools

import jax
import jax.numpy as jnp
from jax.experimental import pallas as pl
from jax.experimental.pallas import tpu as pltpu


def _value_head_kernel(x_ref, wc_ref, bc_ref, w1_ref, b1_ref, w2_ref, b2_ref,
                       o_ref):
    # x_ref : (tn, C, P)   wc_ref: (C, 1)  [conv weight * BN scale]
    # bc_ref: (1, 1)       w1_ref: (P, hid)   b1_ref: (1, hid)
    # w2_ref: (hid, 4)     b2_ref: (1, 4)     o_ref : (tn, 4)
    x = x_ref[...]                                   # (tn, C, P)
    # 1x1 conv C->1 (BN scale already folded into wc): reduce over channels.
    conv = jnp.sum(x * wc_ref[...], axis=1)          # (tn, P)
    h = jnp.maximum(conv + bc_ref[...], 0.0)         # BN shift + ReLU
    # Linear(81 -> hidden) + ReLU
    z = jnp.dot(h, w1_ref[...], preferred_element_type=jnp.float32)
    z = jnp.maximum(z + b1_ref[...], 0.0)            # (tn, hid)
    # Linear(hidden -> 4) + Tanh
    y = jnp.dot(z, w2_ref[...], preferred_element_type=jnp.float32)
    y = jnp.tanh(y + b2_ref[...])                    # (tn, 4)
    o_ref[...] = y.astype(o_ref.dtype)


@functools.partial(jax.jit, static_argnames=("tn",))
def value_head_forward(x_nchw, params, *, tn=128):
    """x_nchw: (N, C, 9, 9) float32.  Returns (N, 4) like the torch module."""
    (wc, g, beta, mu, var, w1, b1, w2, b2) = params
    eps = 1e-3

    N, C, H, W = x_nchw.shape
    P = H * W
    hidden = w1.shape[0]
    assert P == w1.shape[1], "ValueHead requires H*W == 81 (Linear(81, ...))"

    # Fold BatchNorm2d(1) (eval mode, running stats) into the conv weight.
    s = g / jnp.sqrt(var + eps)                     # (1,) scalar scale
    bc = (beta - mu * s).reshape(1, 1)              # (1, 1) scalar shift
    wc_s = (wc.reshape(C) * s).reshape(C, 1)        # (C, 1) scaled conv weight

    # Linear weights: torch (out, in) -> matmul (in, out).
    w1m = w1.T                                      # (P, hidden)
    w2m = w2.T                                      # (hidden, 4)

    # NCHW -> (N, C, P): pure reshape, no transpose / extra HBM pass.
    x3 = x_nchw.reshape(N, C, P)

    # Batch tile: full batch if small, else multiples of 8 (sublane-aligned).
    tn_eff = N if N <= tn else tn
    grid = (pl.cdiv(N, tn_eff),)

    out = pl.pallas_call(
        _value_head_kernel,
        out_shape=jax.ShapeDtypeStruct((N, 4), jnp.float32),
        grid_spec=pltpu.PrefetchScalarGridSpec(
            num_scalar_prefetch=0,
            grid=grid,
            in_specs=[
                pl.BlockSpec((tn_eff, C, P), lambda i: (i, 0, 0)),
                pl.BlockSpec((C, 1), lambda i: (0, 0)),
                pl.BlockSpec((1, 1), lambda i: (0, 0)),
                pl.BlockSpec((P, hidden), lambda i: (0, 0)),
                pl.BlockSpec((1, hidden), lambda i: (0, 0)),
                pl.BlockSpec((hidden, 4), lambda i: (0, 0)),
                pl.BlockSpec((1, 4), lambda i: (0, 0)),
            ],
            out_specs=pl.BlockSpec((tn_eff, 4), lambda i: (i, 0)),
        ),
        compiler_params=pltpu.CompilerParams(
            dimension_semantics=("parallel",)),
    )(x3, wc_s, bc, w1m, b1.reshape(1, hidden), w2m, b2.reshape(1, 4))
    return out


def _reference_forward(x_nchw, params):
    """Pure-JAX reference (same math, no Pallas) for a correctness check."""
    (wc, g, beta, mu, var, w1, b1, w2, b2) = params
    eps = 1e-3
    N, C, H, W = x_nchw.shape
    conv = jnp.einsum("nchw,c->nhw", x_nchw, wc.reshape(-1))      # (N, H, W)
    conv = (conv - mu[0]) / jnp.sqrt(var[0] + eps) * g[0] + beta[0]
    h = jnp.maximum(conv, 0.0).reshape(N, H * W)                  # Flatten
    z = jnp.maximum(h @ w1.T + b1, 0.0)
    return jnp.tanh(z @ w2.T + b2)


if __name__ == "__main__":
    key = jax.random.PRNGKey(0)
    N, C, H, W, HIDDEN = 2, 4, 9, 9, 32   # 9x9 board -> Flatten gives 81

    k = jax.random.split(key, 8)
    x = jax.random.normal(k[0], (N, C, H, W), dtype=jnp.float32)

    # Deterministic synthetic parameters (shapes per Conv2d/BN/Linear init).
    wc = jax.random.normal(k[1], (1, C, 1, 1), dtype=jnp.float32) * 0.3
    g = jnp.ones((1,), jnp.float32) + 0.05 * jax.random.normal(k[2], (1,))
    beta = 0.02 * jax.random.normal(k[3], (1,))
    mu = jnp.zeros((1,), jnp.float32)            # running_mean init
    var = jnp.ones((1,), jnp.float32)            # running_var init

    w1 = jax.random.normal(k[4], (HIDDEN, H * W), dtype=jnp.float32) * 0.1
    b1 = 0.05 * jax.random.normal(k[5], (HIDDEN,))
    w2 = jax.random.normal(k[6], (4, HIDDEN), dtype=jnp.float32) * 0.2
    b2 = 0.05 * jax.random.normal(k[7], (4,))

    params = (wc, g, beta, mu, var, w1, b1, w2, b2)

    out = value_head_forward(x, params)
    out = jax.block_until_ready(out)

    ref = _reference_forward(x, params)
    assert out.shape == (N, 4)
    assert jnp.allclose(out, ref, atol=1e-4, rtol=1e-4)
    print("KERNEL_OK")
</pallas_src>

<mosaic_0001>
module attributes {stable_mosaic.version = 11 : i64} {
  func.func @_value_head_kernel(%arg0: i32, %arg1: memref<2x4x81xf32, #tpu.memory_space<vmem>>, %arg2: memref<4x1xf32, #tpu.memory_space<vmem>>, %arg3: memref<1x1xf32, #tpu.memory_space<vmem>>, %arg4: memref<81x32xf32, #tpu.memory_space<vmem>>, %arg5: memref<1x32xf32, #tpu.memory_space<vmem>>, %arg6: memref<32x4xf32, #tpu.memory_space<vmem>>, %arg7: memref<1x4xf32, #tpu.memory_space<vmem>>, %arg8: memref<2x4xf32, #tpu.memory_space<vmem>>) attributes {dimension_semantics = [#tpu.dimension_semantics<parallel>], iteration_bounds = array<i64: 1>, scalar_prefetch = 0 : i64, scratch_operands = 0 : i64, tpu.core_type = #tpu.core_type<tc>, window_params = [{transform_indices = @transform_0, window_bounds = array<i64: 2, 4, 81>}, {pipeline_mode = #tpu.pipeline_mode<synchronous>, transform_indices = @transform_1, window_bounds = array<i64: 4, 1>}, {pipeline_mode = #tpu.pipeline_mode<synchronous>, transform_indices = @transform_2, window_bounds = array<i64: 1, 1>}, {pipeline_mode = #tpu.pipeline_mode<synchronous>, transform_indices = @transform_3, window_bounds = array<i64: 81, 32>}, {pipeline_mode = #tpu.pipeline_mode<synchronous>, transform_indices = @transform_4, window_bounds = array<i64: 1, 32>}, {pipeline_mode = #tpu.pipeline_mode<synchronous>, transform_indices = @transform_5, window_bounds = array<i64: 32, 4>}, {pipeline_mode = #tpu.pipeline_mode<synchronous>, transform_indices = @transform_6, window_bounds = array<i64: 1, 4>}, {transform_indices = @transform_7, window_bounds = array<i64: 2, 4>}]} {
    %c0 = arith.constant 0 : index
    %c0_0 = arith.constant 0 : index
    %c0_1 = arith.constant 0 : index
    %0 = vector.load %arg1[%c0, %c0_0, %c0_1] : memref<2x4x81xf32, #tpu.memory_space<vmem>>, vector<2x4x81xf32>
    %c0_2 = arith.constant 0 : index
    %c0_3 = arith.constant 0 : index
    %1 = vector.load %arg2[%c0_2, %c0_3] : memref<4x1xf32, #tpu.memory_space<vmem>>, vector<4x1xf32>
    %2 = vector.shape_cast %1 : vector<4x1xf32> to vector<1x4x1xf32>
    %3 = vector.broadcast %2 : vector<1x4x1xf32> to vector<2x4x81xf32>
    %4 = arith.mulf %0, %3 : vector<2x4x81xf32>
    %cst = arith.constant dense<0.000000e+00> : vector<2x81xf32>
    %5 = vector.multi_reduction <add>, %4, %cst [1] : vector<2x4x81xf32> to vector<2x81xf32>
    %c0_4 = arith.constant 0 : index
    %c0_5 = arith.constant 0 : index
    %6 = vector.load %arg3[%c0_4, %c0_5] : memref<1x1xf32, #tpu.memory_space<vmem>>, vector<1x1xf32>
    %7 = vector.broadcast %6 : vector<1x1xf32> to vector<2x81xf32>
    %8 = arith.addf %5, %7 : vector<2x81xf32>
    %cst_6 = arith.constant 0.000000e+00 : f32
    %9 = vector.broadcast %cst_6 : f32 to vector<2x81xf32>
    %10 = arith.maximumf %8, %9 : vector<2x81xf32>
    %c0_7 = arith.constant 0 : index
    %c0_8 = arith.constant 0 : index
    %11 = vector.load %arg4[%c0_7, %c0_8] : memref<81x32xf32, #tpu.memory_space<vmem>>, vector<81x32xf32>
    %cst_9 = arith.constant dense<0.000000e+00> : vector<2x32xf32>
    %12 = tpu.matmul %10, %11, %cst_9 {dimension_numbers = #tpu.dot_dimension_numbers<[1], [0], [0], [1], [0, 0, 1, 1], [], []>} : vector<2x81xf32>, vector<81x32xf32>, vector<2x32xf32> -> vector<2x32xf32>
    %c0_10 = arith.constant 0 : index
    %c0_11 = arith.constant 0 : index
    %13 = vector.load %arg5[%c0_10, %c0_11] : memref<1x32xf32, #tpu.memory_space<vmem>>, vector<1x32xf32>
    %14 = vector.broadcast %13 : vector<1x32xf32> to vector<2x32xf32>
    %15 = arith.addf %12, %14 : vector<2x32xf32>
    %cst_12 = arith.constant 0.000000e+00 : f32
    %16 = vector.broadcast %cst_12 : f32 to vector<2x32xf32>
    %17 = arith.maximumf %15, %16 : vector<2x32xf32>
    %c0_13 = arith.constant 0 : index
    %c0_14 = arith.constant 0 : index
    %18 = vector.load %arg6[%c0_13, %c0_14] : memref<32x4xf32, #tpu.memory_space<vmem>>, vector<32x4xf32>
    %cst_15 = arith.constant dense<0.000000e+00> : vector<2x4xf32>
    %19 = tpu.matmul %17, %18, %cst_15 {dimension_numbers = #tpu.dot_dimension_numbers<[1], [0], [0], [1], [0, 0, 1, 1], [], []>} : vector<2x32xf32>, vector<32x4xf32>, vector<2x4xf32> -> vector<2x4xf32>
    %c0_16 = arith.constant 0 : index
    %c0_17 = arith.constant 0 : index
    %20 = vector.load %arg7[%c0_16, %c0_17] : memref<1x4xf32, #tpu.memory_space<vmem>>, vector<1x4xf32>
    %21 = vector.broadcast %20 : vector<1x4xf32> to vector<2x4xf32>
    %22 = arith.addf %19, %21 : vector<2x4xf32>
    %23 = math.tanh %22 : vector<2x4xf32>
    %c0_18 = arith.constant 0 : index
    %c0_19 = arith.constant 0 : index
    %24 = vector.load %arg8[%c0_18, %c0_19] : memref<2x4xf32, #tpu.memory_space<vmem>>, vector<2x4xf32>
    tpu.vector_store %arg8[%c0_18, %c0_19], %23 {strides = array<i32>} : memref<2x4xf32, #tpu.memory_space<vmem>>, vector<2x4xf32>,
    return
  }
  func.func @transform_0(%arg0: i32) -> (i32, i32, i32) {
    %c0_i32 = arith.constant 0 : i32
    %c0_i32_0 = arith.constant 0 : i32
    %c0_i32_1 = arith.constant 0 : i32
    return %arg0, %c0_i32, %c0_i32_0 : i32, i32, i32
  }
  func.func @transform_1(%arg0: i32) -> (i32, i32) {
    %c0_i32 = arith.constant 0 : i32
    %c0_i32_0 = arith.constant 0 : i32
    %c0_i32_1 = arith.constant 0 : i32
    return %c0_i32, %c0_i32_0 : i32, i32
  }
  func.func @transform_2(%arg0: i32) -> (i32, i32) {
    %c0_i32 = arith.constant 0 : i32
    %c0_i32_0 = arith.constant 0 : i32
    %c0_i32_1 = arith.constant 0 : i32
    return %c0_i32, %c0_i32_0 : i32, i32
  }
  func.func @transform_3(%arg0: i32) -> (i32, i32) {
    %c0_i32 = arith.constant 0 : i32
    %c0_i32_0 = arith.constant 0 : i32
    %c0_i32_1 = arith.constant 0 : i32
    return %c0_i32, %c0_i32_0 : i32, i32
  }
  func.func @transform_4(%arg0: i32) -> (i32, i32) {
    %c0_i32 = arith.constant 0 : i32
    %c0_i32_0 = arith.constant 0 : i32
    %c0_i32_1 = arith.constant 0 : i32
    return %c0_i32, %c0_i32_0 : i32, i32
  }
  func.func @transform_5(%arg0: i32) -> (i32, i32) {
    %c0_i32 = arith.constant 0 : i32
    %c0_i32_0 = arith.constant 0 : i32
    %c0_i32_1 = arith.constant 0 : i32
    return %c0_i32, %c0_i32_0 : i32, i32
  }
  func.func @transform_6(%arg0: i32) -> (i32, i32) {
    %c0_i32 = arith.constant 0 : i32
    %c0_i32_0 = arith.constant 0 : i32
    %c0_i32_1 = arith.constant 0 : i32
    return %c0_i32, %c0_i32_0 : i32, i32
  }
  func.func @transform_7(%arg0: i32) -> (i32, i32) {
    %c0_i32 = arith.constant 0 : i32
    %c0_i32_0 = arith.constant 0 : i32
    return %arg0, %c0_i32 : i32, i32
  }
}

</mosaic_0001>

<bundles_post_ra>
// kernel: value_head_forward.1
= control target key start
LH: loop header
LB: loop body
LE: loop exit
PB: predicated region body
PF: predicated region fallthrough
CT: control target
= control target key end

     0   :  { %s502_s0 = inlined_call_operand.vmem [shape: f32[2,4,81], index: 0, kind: input, shape index: {}]   ;;  %s503_s1 = inlined_call_operand.vmem [shape: f32[4,1], index: 1, kind: input, shape index: {}]   ;;  %s504_s2 = inlined_call_operand.<no memory space> [shape: f32[1,1], index: 2, kind: input, shape index: {}]   ;;  %s505_s3 = inlined_call_operand.vmem [shape: f32[81,32], index: 3, kind: input, shape index: {}]   ;;  %s506_s4 = inlined_call_operand.vmem [shape: f32[1,32], index: 4, kind: input, shape index: {}]   ;;  %s507_s5 = inlined_call_operand.vmem [shape: f32[32,4], index: 5, kind: input, shape index: {}]   ;;  %s508_s6 = inlined_call_operand.vmem [shape: f32[1,4], index: 6, kind: input, shape index: {}]   ;;  %s509_s7 = inlined_call_operand.hbm [shape: f32[2,4], index: 7, kind: output, shape index: {}]  }
   0x1   :  { %v12_v0 = vstv %s504_s2 }
   0x2   :  { %13 = vst [vmem:[#allocation2] sm:$0x1] %v12_v0 }
   0x3   :  { %v31_v1 = vld [vmem:[%s503_s1] sm:$0xf]  ;;  %v382_v2 = vmov 0   ;;  %v383_v3 = vmov 0.0|0.0   ;;  %v69_v5 = vld [vmem:[%s505_s3 + $0x8] sm:$0xff]  ;;  %v70_v7 = vld [vmem:[%s505_s3 + $0x10] sm:$0xff] }
   0x4   :  { %355 = vset.pattern.permute.xlu0 %v382_v2  ;;  %329 = vmatprep.subr.bf16.mxu0 %v383_v3  ;;  %v68_v4 = vld [vmem:[%s505_s3] sm:$0xff]  ;;  %v71_v8 = vld [vmem:[%s505_s3 + $0x18] sm:$0xff] }
   0x5   :  { %34 = vperm.xlu0 %355, %v31_v1   ;;  %v330_v6 = vpack.c.bf16 %v69_v5, %v68_v4  ;;  %344 = vmatprep.subr.bf16.mxu1 %v383_v3 }
   0x9   :  { %v270_v9 = vld [vmem:[#allocation2] ss:$0 sm:$0xff] }
   0xa   :  { %14 = vsyncpa [#allocation4], 0  ;;  %331 = vmatpush3.bf16.msra.mxu0 %v330_v6  ;;  %v333_v10 = vpack.c.bf16 %v71_v8, %v70_v7  ;;  %61 = vperm.xlu0 %355, %v270_v9   ;;  %v72_v11 = vld [vmem:[%s505_s3 + $0x20] sm:$0xff]  ;;  %v73_v12 = vld [vmem:[%s505_s3 + $0x28] sm:$0xff]  ;;  %vm384_vm0 = vmmov 0   ;;  %v385_v20 = vmov 0.0  }
   0xb   :  { %332 = vmatprep.subr.bf16.mxu0 %v383_v3  ;;  %v336_v13 = vpack.c.bf16 %v73_v12, %v72_v11  ;;  %v74_v14 = vld [vmem:[%s505_s3 + $0x30] sm:$0xff]  ;;  %v75_v15 = vld [vmem:[%s505_s3 + $0x38] sm:$0xff]  ;;  %v76_v17 = vld [vmem:[%s505_s3 + $0x40] sm:$0xff]  ;;  %315 = vmatprep.mubr.msk.f32.mxu0 %vm384_vm0, %v385_v20  ;;  %vm93_vm1 = vcmask 1040384   ;;  %vm39_vm2 = vcmask 658432   ;;  %vm88_vm3 = vcmask 1041409  }
   0xc   :  { %v339_v16 = vpack.c.bf16 %v75_v15, %v74_v14  ;;  %v77_v18 = vld [vmem:[%s505_s3 + $0x48] sm:$0xff]  ;;  %v78_v21 = vld [vmem:[%s505_s3 + $0x50] sm:$0x1]  ;;  %326 = vmatprep.mubr.msk.f32.mxu1 %vm384_vm0, %v385_v20  ;;  %v168_v22 = vld [vmem:[%s507_s5] sm:$0xff]  ;;  %vm90_vm4 = vcmask 662528   ;;  %vm179_vm5 = vcmask 261120  }
   0xd   :  { %v342_v19 = vpack.c.bf16 %v77_v18, %v76_v17  ;;  %v169_v23 = vld [vmem:[%s507_s5 + $0x8] sm:$0xff]  ;;  %v29_v25 = vld [vmem:[%s502_s0] sm:$0xf]  ;;  %v30_v26 = vld [vmem:[%s502_s0 + $0x4] sm:$0xf]  ;;  %vm254_vm6 = vcmask 25600  }
   0xe   :  { %334 = vmatpush3.bf16.msra.mxu0 %v333_v10  ;;  %v345_v24 = vpack.c.bf16 %v169_v23, %v168_v22  ;;  %v170_v50 = vld [vmem:[%s507_s5 + $0x10] sm:$0xff]  ;;  %v171_v51 = vld [vmem:[%s507_s5 + $0x18] sm:$0xff]  ;;  %v271_v53 = vld [vmem:[%s506_s4] ss:$0 sm:$0xff]  ;;  %s386_s5 = smov [#allocation3]  }
   0xf   :  { %335 = vmatprep.subr.bf16.mxu0 %v383_v3  ;;  %v348_v52 = vpack.c.bf16 %v171_v51, %v170_v50  ;;  %v274_v58 = vld [vmem:[%s508_s6] ss:$0 sm:$0xff]  ;;  %s262_s14 = sshll.u32 %s386_s5, 4  ;;  %s263_s14 = int_to_ptr.vmem [resolvable:$true] %s262_s14 }
  0x10   :  { %346 = vmatpush3.bf16.msra.mxu1 %v345_v24  ;;  %s358_s4 = scalar_lea.vmem %s263_s14, 32  ;;  %p363_p1 = scmp.lt.s32.totalorder %s263_s14, %s263_s14 }
  0x11   :  { %347 = vmatprep.subr.bf16.mxu1 %v383_v3  ;;  %p359_p0 = scmp.ne.s32.totalorder %s263_s14, %s358_s4  ;;  %p364_p2 = scmp.lt.s32.totalorder %s358_s4, %s358_s4 }
  0x12   :  { %337 = vmatpush3.bf16.msra.mxu0 %v336_v13 }
  0x13   :  { %338 = vmatprep.subr.bf16.mxu0 %v383_v3  ;;  %p365_p3 = por %p364_p2, %p363_p1 }
  0x14   :  { %349 = vmatpush3.bf16.msra.mxu1 %v348_v52 }
  0x15   :  { %p366_p4 = pnand %p365_p3, %p359_p0 }
  0x16   :  { %340 = vmatpush3.bf16.msra.mxu0 %v339_v16 }
  0x17   :  { %341 = vmatprep.subr.bf16.mxu0 %v383_v3 }
  0x1a   :  { %343 = vmatpush3.bf16.msra.mxu0 %v342_v19 }
  0x1b   :  { %313 = vmatprep.subr.mxu0 %v385_v20 }
  0x1e   :  { %314 = vmatpush3.msk.msra.mxu0 %vm93_vm1, %v78_v21 }
  0x84   :  { %v35_v27 = vpop.permute.xlu0 %34 }
  0x85   :  { %v37_v28 = vmul.f32 %v35_v27, %v29_v25  ;;  %v38_v29 = vmul.f32 %v35_v27, %v30_v26 }
  0x87   :  { %v40_v30 = vsel %vm39_vm2, %v37_v28, 0.0  ;;  %v47_v31 = vsel %vm39_vm2, %v38_v29, 0.0 }
  0x88   :  { %v41_v32 = vrot.slane %v40_v30, 4  ;;  %v48_v33 = vrot.slane %v47_v31, 4 }
  0x89   :  { %v62_v44 = vpop.permute.xlu0 %61 }
  0x8a   :  { %v42_v34 = vadd.f32 %v41_v32, %v40_v30  ;;  %v49_v35 = vadd.f32 %v48_v33, %v47_v31 }
  0x8c   :  { %v43_v36 = vrot.slane %v42_v34, 2  ;;  %v50_v37 = vrot.slane %v49_v35, 2 }
  0x8e   :  { %v44_v38 = vadd.f32 %v43_v36, %v42_v34  ;;  %v51_v39 = vadd.f32 %v50_v37, %v49_v35 }
  0x90   :  { %v45_v40 = vrot.slane %v44_v38, 1  ;;  %v52_v41 = vrot.slane %v51_v39, 1 }
  0x92   :  { %v46_v42 = vadd.f32 %v45_v40, %v44_v38  ;;  %v53_v43 = vadd.f32 %v52_v41, %v51_v39 }
  0x94   :  { %v64_v45 = vadd.f32 %v62_v44, %v46_v42  ;;  %v65_v46 = vadd.f32 %v62_v44, %v53_v43 }
  0x96   :  { %v66_v47 = vmax.f32 %v64_v45, 0.0  ;;  %v67_v48 = vmax.f32 %v65_v46, 0.0 }
  0x98   :  { %v89_v49 = vsel %vm88_vm3, %v67_v48, %v66_v47 }
  0x99   :  { %316 = vmatmul.mubr.msk.f32.vlgmr.msra.gmra.mrb[0].mxu0 %vm90_vm4, %v89_v49 }
 0x16c   :  { %v163_v54 = vpop.f32.mrb[0].mxu0 }
 0x16d   :  { %v164_v55 = vadd.f32 %v271_v53, %v163_v54  ;;  %v317_v56 = vpop.f32.mrb[1].mxu0 }
 0x16f   :  { %v167_v57 = vmax.f32 %v164_v55, 0.0 }
 0x171   :  { %327 = vmatmul.mubr.msk.f32.vlgmr.msra.gmra.mrb[0].mxu1 %vm179_vm5, %v167_v57 }
 0x244   :  { %v249_v59 = vpop.f32.mrb[0].mxu1 }
 0x245   :  { %v250_v60 = vadd.f32 %v274_v58, %v249_v59  ;;  %v328_v61 = vpop.f32.mrb[1].mxu1 }
 0x247   :  { %356 = vtanh.f32 %v250_v60 }
 0x251   :  { %v357_v62 = vpop.eup %356 }
 0x252   :  { %255 = vst.msk [vmem:[#allocation3] sm:$0x3] %vm254_vm6, %v357_v62 }
 0x253   :  { %369 = shalt.err (!%p366_p4)
}
 0x254   :  { %s370_s6 = scalar_lea.hbm %s509_s7, 32 }
 0x255   :  { %p371_p5 = scmp.ne.s32.totalorder %s509_s7, %s370_s6  ;;  %p374_p6 = scmp.lt.u32.totalorder %s370_s6, %s509_s7 }
 0x257   :  { %p376_p7 = pnand %p374_p6, %p371_p5 }
 0x259   :  { %379 = shalt.err (!%p376_p7)
}
 0x25a   :  { %265 = dma.vmem_to_hbm [thread:$0]  %s263_s14, 32, %s509_s7, [#allocation4]  }
 0x25b   :  { %380 = dma.done.wait [#allocation4], 32  }
 0x25c   :  { %381 = vsyncadd [#allocation4], 4294967264 }
 0x25d   :  { %269 = vsyncpa [#allocation4], 1 }

</bundles_post_ra>
